<compile_context>
chip_gen: v6e
topology: v6e:2x2x1
jax: 0.10.0
libtpu: 0.0.40
codegen_flags: <defaults>
</compile_context>

<pallas_src>
import jax
import jax.numpy as jnp
from jax.experimental import pallas as pl
from jax.experimental.pallas import tpu as pltpu

LANES = 128
SUBLANES = 8
PAD_UNIT = SUBLANES * LANES          # 1024: keeps `rows` a multiple of 8
MAX_TILE_ROWS = 4096                 # 2 MiB f32 block per input; safe on v5e/v6e/v7x


def _round_up(x, m):
    return ((x + m - 1) // m) * m


def _make_partial_sq_err_kernel(rows, tile_rows, num_blocks):
    """Per-block squared-error partial sums folded to an (8, LANES) f32 tile."""
    needs_mask = (num_blocks * tile_rows) != rows

    def kernel(x_ref, y_ref, o_ref):
        d = x_ref[...].astype(jnp.float32) - y_ref[...].astype(jnp.float32)
        sq = d * d
        if needs_mask:
            # Rows past the true end of the (rows, LANES) slab in the last
            # (partial) block are out-of-bounds reads with undefined contents:
            # zero them before accumulating.
            row0 = pl.program_id(0) * tile_rows
            row_idx = row0 + jax.lax.broadcasted_iota(jnp.int32, sq.shape, 0)
            sq = jnp.where(row_idx < rows, sq, 0.0)
        # Vector-shaped partial sum: (tile_rows, 128) -> (8, 128) via pure VPU
        # adds (no per-step cross-lane reduce, no serialized (1,1) scalar RMW).
        o_ref[...] = sq.reshape(tile_rows // SUBLANES, SUBLANES, LANES).sum(axis=0)

    return kernel


def _as_lane_slab(a):
    """Flatten to a lane-dense (rows, 128) slab with rows % 8 == 0.

    Only a sub-1024-element zero tail is appended when needed; for element
    counts that are already multiples of 1024 this is a free reshape view.
    """
    flat = a.reshape(-1)
    n = flat.shape[0]
    rem = n % PAD_UNIT
    if rem:
        flat = jnp.concatenate([flat, jnp.zeros((PAD_UNIT - rem,), flat.dtype)])
    return flat.reshape(-1, LANES)


def f5_iou_bce_loss(x, five_gt_masks, gt_mask=None, pic_num=5):
    """Pallas implementation of F5_IoU_BCELoss.forward (== nn.MSELoss() mean)."""
    del gt_mask, pic_num  # unused in the reference forward
    assert x.shape == five_gt_masks.shape, (x.shape, five_gt_masks.shape)
    n = x.size  # true (unpadded) element count, static

    x2d = _as_lane_slab(x)
    y2d = _as_lane_slab(five_gt_masks)
    rows = x2d.shape[0]                       # multiple of 8 by construction

    tile_rows = min(MAX_TILE_ROWS, _round_up(rows, SUBLANES))
    tile_rows = min(tile_rows, rows)          # rows is a multiple of 8, so ok
    num_blocks = pl.cdiv(rows, tile_rows)

    kernel = _make_partial_sq_err_kernel(rows, tile_rows, num_blocks)

    partials = pl.pallas_call(
        kernel,
        out_shape=jax.ShapeDtypeStruct((num_blocks * SUBLANES, LANES), jnp.float32),
        grid=(num_blocks,),
        in_specs=[
            pl.BlockSpec((tile_rows, LANES), lambda i: (i, 0)),
            pl.BlockSpec((tile_rows, LANES), lambda i: (i, 0)),
        ],
        out_specs=pl.BlockSpec((SUBLANES, LANES), lambda i: (i, 0)),
        compiler_params=pltpu.CompilerParams(
            # Each block writes its own independent partial -> megacore chips
            # (v7x / v5p) shard the grid across both TensorCores; no-op on
            # single-core chips (v5e / v6e).
            dimension_semantics=("parallel",),
        ),
    )(x2d, y2d)

    # Tiny (num_blocks*8, 128) final reduce + mean in plain JAX.
    return jnp.sum(partials) / jnp.float32(n)


if __name__ == "__main__":
    key = jax.random.PRNGKey(0)
    k1, k2, k3 = jax.random.split(key, 3)

    # Small shapes matching the module: pic_num = 5 mask predictions.
    B, PIC, H, W = 2, 5, 16, 16
    x = jax.random.uniform(k1, (B, PIC, H, W), dtype=jnp.float32)
    five_gt_masks = (jax.random.uniform(k2, (B, PIC, H, W)) > 0.5).astype(jnp.float32)
    gt_mask = (jax.random.uniform(k3, (B, 1, H, W)) > 0.5).astype(jnp.float32)

    loss = f5_iou_bce_loss(x, five_gt_masks, gt_mask)
    loss = jax.block_until_ready(loss)
    ref = jnp.mean((x - five_gt_masks) ** 2)
    assert jnp.allclose(loss, ref, atol=1e-6, rtol=1e-6), (loss, ref)

    # Second check: large enough to exercise the multi-block, masked-tail path.
    k4, k5 = jax.random.split(k3)
    x2 = jax.random.uniform(k4, (2, 5, 256, 256), dtype=jnp.float32)
    y2 = (jax.random.uniform(k5, (2, 5, 256, 256)) > 0.5).astype(jnp.float32)
    loss2 = jax.block_until_ready(f5_iou_bce_loss(x2, y2))
    ref2 = jnp.mean((x2 - y2) ** 2)
    assert jnp.allclose(loss2, ref2, atol=1e-6, rtol=1e-5), (loss2, ref2)

    print("KERNEL_OK")
</pallas_src>

<mosaic_0001>
module attributes {stable_mosaic.version = 11 : i64} {
  func.func @kernel(%arg0: i32, %arg1: memref<24x128xf32, #tpu.memory_space<vmem>>, %arg2: memref<24x128xf32, #tpu.memory_space<vmem>>, %arg3: memref<8x128xf32, #tpu.memory_space<vmem>>) attributes {dimension_semantics = [#tpu.dimension_semantics<parallel>], iteration_bounds = array<i64: 1>, scalar_prefetch = 0 : i64, scratch_operands = 0 : i64, tpu.core_type = #tpu.core_type<tc>, window_params = [{transform_indices = @transform_0, window_bounds = array<i64: 24, 128>}, {transform_indices = @transform_1, window_bounds = array<i64: 24, 128>}, {transform_indices = @transform_2, window_bounds = array<i64: 8, 128>}]} {
    %c0 = arith.constant 0 : index
    %c0_0 = arith.constant 0 : index
    %0 = vector.load %arg1[%c0, %c0_0] : memref<24x128xf32, #tpu.memory_space<vmem>>, vector<24x128xf32>
    %c0_1 = arith.constant 0 : index
    %c0_2 = arith.constant 0 : index
    %1 = vector.load %arg2[%c0_1, %c0_2] : memref<24x128xf32, #tpu.memory_space<vmem>>, vector<24x128xf32>
    %2 = arith.subf %0, %1 : vector<24x128xf32>
    %3 = arith.mulf %2, %2 : vector<24x128xf32>
    %4 = vector.shape_cast %3 : vector<24x128xf32> to vector<3x8x128xf32>
    %cst = arith.constant dense<0.000000e+00> : vector<8x128xf32>
    %5 = vector.multi_reduction <add>, %4, %cst [0] : vector<3x8x128xf32> to vector<8x128xf32>
    %c0_3 = arith.constant 0 : index
    %c0_4 = arith.constant 0 : index
    %6 = vector.load %arg3[%c0_3, %c0_4] : memref<8x128xf32, #tpu.memory_space<vmem>>, vector<8x128xf32>
    tpu.vector_store %arg3[%c0_3, %c0_4], %5 {strides = array<i32>} : memref<8x128xf32, #tpu.memory_space<vmem>>, vector<8x128xf32>,
    return
  }
  func.func @transform_0(%arg0: i32) -> (i32, i32) {
    %c0_i32 = arith.constant 0 : i32
    %c0_i32_0 = arith.constant 0 : i32
    return %arg0, %c0_i32 : i32, i32
  }
  func.func @transform_1(%arg0: i32) -> (i32, i32) {
    %c0_i32 = arith.constant 0 : i32
    %c0_i32_0 = arith.constant 0 : i32
    return %arg0, %c0_i32 : i32, i32
  }
  func.func @transform_2(%arg0: i32) -> (i32, i32) {
    %c0_i32 = arith.constant 0 : i32
    %c0_i32_0 = arith.constant 0 : i32
    return %arg0, %c0_i32 : i32, i32
  }
}

</mosaic_0001>

<bundles_post_ra>
// kernel: tpu_custom_call.1
= control target key start
LH: loop header
LB: loop body
LE: loop exit
PB: predicated region body
PF: predicated region fallthrough
CT: control target
= control target key end

     0   :  { %7 = vsyncpa [#allocation3], 0  ;;  %s171_s0 = inlined_call_operand.hbm [shape: f32[24,128], index: 0, kind: input, shape index: {}]   ;;  %s172_s1 = inlined_call_operand.hbm [shape: f32[24,128], index: 1, kind: input, shape index: {}]   ;;  %s173_s2 = inlined_call_operand.hbm [shape: f32[8,128], index: 2, kind: output, shape index: {}]  }
   0x1   :  { %8 = vsyncpa [#allocation6], 0 }
   0x2   :  { %9 = vsyncpa [#allocation4], 0  ;;  %s142_s9 = smov [#allocation2]  }
   0x3   :  { %s15_s10 = sshll.u32 %s142_s9, 4  ;;  %s16_s10 = int_to_ptr.vmem [resolvable:$true] %s15_s10 }
   0x4   :  { %s84_s11 = scalar_lea.vmem %s16_s10, 384  ;;  %p89_p1 = scmp.lt.s32.totalorder %s16_s10, %s16_s10 }
   0x5   :  { %p85_p0 = scmp.ne.s32.totalorder %s16_s10, %s84_s11  ;;  %p90_p2 = scmp.lt.s32.totalorder %s84_s11, %s84_s11 }
   0x7   :  { %p91_p3 = por %p90_p2, %p89_p1 }
   0x9   :  { %p92_p4 = pnand %p91_p3, %p85_p0 }
   0xb   :  { %95 = shalt.err (!%p92_p4)
}
   0xc   :  { %s143_s12 = smov 128   ;;  %s144_s13 = smov 8  }
   0xd   :  { %21 = dma.hbm_to_vmem [thread:$0]  %s171_s0, 384, %s16_s10, [#allocation3], %s143_s12, %s143_s12, %s144_s13  }
   0xe   :  { %s145_s16 = smov [#allocation5]  }
   0xf   :  { %s27_s17 = sshll.u32 %s145_s16, 4  ;;  %s28_s17 = int_to_ptr.vmem [resolvable:$true] %s27_s17 }
  0x10   :  { %s104_s18 = scalar_lea.vmem %s28_s17, 384  ;;  %p109_p6 = scmp.lt.s32.totalorder %s28_s17, %s28_s17 }
  0x11   :  { %p105_p5 = scmp.ne.s32.totalorder %s28_s17, %s104_s18  ;;  %p110_p7 = scmp.lt.s32.totalorder %s104_s18, %s104_s18 }
  0x13   :  { %p111_p8 = por %p110_p7, %p109_p6 }
  0x15   :  { %p112_p9 = pnand %p111_p8, %p105_p5 }
  0x17   :  { %115 = shalt.err (!%p112_p9)
}
  0x18   :  { %33 = dma.hbm_to_vmem [thread:$0]  %s172_s1, 384, %s28_s17, [#allocation6], %s143_s12, %s143_s12, %s144_s13  }
  0x19   :  { %136 = dma.done.wait [#allocation3], 384  }
  0x1a   :  { %137 = vsyncadd [#allocation3], 4294966912 }
  0x1b   :  { %138 = dma.done.wait [#allocation6], 384  }
  0x1c   :  { %139 = vsyncadd [#allocation6], 4294966912  ;;  %v40_v0 = vld [vmem:[#allocation2] sm:$0xff]  ;;  %v41_v1 = vld [vmem:[#allocation2 + $0x8] sm:$0xff]  ;;  %s146_s0 = smov [#allocation7]  }
  0x1d   :  { %v42_v2 = vld [vmem:[#allocation2 + $0x10] sm:$0xff]  ;;  %v43_v3 = vld [vmem:[#allocation5] sm:$0xff]  ;;  %v44_v4 = vld [vmem:[#allocation5 + $0x8] sm:$0xff]  ;;  %s61_s21 = sshll.u32 %s146_s0, 4  ;;  %s62_s21 = int_to_ptr.vmem [resolvable:$true] %s61_s21 }
  0x1e   :  { %v45_v5 = vld [vmem:[#allocation5 + $0x10] sm:$0xff]  ;;  %v46_v6 = vsub.f32 %v40_v0, %v43_v3  ;;  %v47_v7 = vsub.f32 %v41_v1, %v44_v4  ;;  %s116_s1 = scalar_lea.vmem %s62_s21, 128  ;;  %p121_p11 = scmp.lt.s32.totalorder %s62_s21, %s62_s21 }
  0x1f   :  { %v48_v8 = vsub.f32 %v42_v2, %v45_v5  ;;  %p117_p10 = scmp.ne.s32.totalorder %s62_s21, %s116_s1  ;;  %p122_p12 = scmp.lt.s32.totalorder %s116_s1, %s116_s1 }
  0x20   :  { %v49_v9 = vmul.f32 %v46_v6, %v46_v6  ;;  %v50_v10 = vmul.f32 %v47_v7, %v47_v7 }
  0x21   :  { %v51_v11 = vmul.f32 %v48_v8, %v48_v8  ;;  %p123_p13 = por %p122_p12, %p121_p11 }
  0x22   :  { %v52_v12 = vadd.f32 %v50_v10, %v49_v9 }
  0x23   :  { %p124_p0 = pnand %p123_p13, %p117_p10 }
  0x24   :  { %v53_v13 = vadd.f32 %v52_v12, %v51_v11 }
  0x26   :  { %54 = vst [vmem:[#allocation7] sm:$0xff] %v53_v13 }
  0x27   :  { %127 = shalt.err (!%p124_p0)
}
  0x28   :  { %64 = dma.vmem_to_hbm [thread:$0]  %s62_s21, 128, %s173_s2, [#allocation4]  }
  0x29   :  { %140 = dma.done.wait [#allocation4], 128  }
  0x2a   :  { %141 = vsyncadd [#allocation4], 4294967168 }
  0x2b   :  { %68 = vsyncpa [#allocation3], 1 }
  0x2c   :  { %69 = vsyncpa [#allocation6], 1 }
  0x2d   :  { %70 = vsyncpa [#allocation4], 1 }

</bundles_post_ra>
